<compile_context>
chip_gen: v7x
topology: tpu7x:2x2x1
jax: 0.10.0
libtpu: 0.0.40
codegen_flags: <defaults>
</compile_context>

<pallas_src>
import functools

import jax
import jax.numpy as jnp
from jax import lax
from jax.experimental import pallas as pl
from jax.experimental.pallas import tpu as pltpu

_LANE = 128
_SUBLANE = 8


def _round_up(x, m):
    return (x + m - 1) // m * m


def _int_pow(w, gamma: int):
    """(1 - pt) ** gamma for non-negative integer gamma as a multiply chain."""
    result = None
    base = w
    g = gamma
    while g:
        if g & 1:
            result = base if result is None else result * base
        g >>= 1
        if g:
            base = base * base
    if result is None:  # gamma == 0
        return jnp.ones_like(w)
    return result


def _focal_loss_kernel(logits_ref, tgt_ref, out_ref, *, gamma, n_total, tile_n):
    """One grid step: (TN, C) logits + (TN, 1) targets -> one partial loss sum.

    The tile's partial sum is broadcast into an independent lane-dense
    (1, 8, 128) output block (unmasked stores, no cross-step dependency), so
    the grid axis is fully parallel.
    """
    i = pl.program_id(0)

    x = logits_ref[...].astype(jnp.float32)                      # (TN, C)

    # Numerically stable log-softmax pieces; only the softmax denominator
    # touches a full-tile exp, and (x - m) has that single consumer.
    m = jnp.max(x, axis=-1, keepdims=True)                       # (TN, 1)
    sumexp = jnp.sum(jnp.exp(x - m), axis=-1, keepdims=True)     # (TN, 1)

    # gather(dim=1, target): one-hot masked lane reduction directly on x.
    tgt = tgt_ref[...]                                           # (TN, 1) int32
    col = lax.broadcasted_iota(jnp.int32, x.shape, 1)            # (TN, C)
    x_t = jnp.sum(jnp.where(col == tgt, x, 0.0),
                  axis=-1, keepdims=True)                        # (TN, 1)

    logpt_t = (x_t - m) - jnp.log(sumexp)                        # (TN, 1)
    pt_t = jnp.exp(logpt_t)
    w = 1.0 - pt_t

    if isinstance(gamma, int) and not isinstance(gamma, bool) and gamma >= 0:
        wg = _int_pow(w, int(gamma))                             # multiply chain
    else:
        wg = w ** jnp.float32(gamma)

    loss = -wg * logpt_t                                         # (TN, 1)

    # Mask the ragged tail rows of the last block (select, not multiply, so
    # Inf/NaN produced from undefined tail data cannot propagate).
    if n_total % tile_n:
        row = i * tile_n + lax.broadcasted_iota(jnp.int32, loss.shape, 0)
        loss = jnp.where(row < n_total, loss, 0.0)

    partial = jnp.sum(loss)                                      # scalar
    out_ref[...] = jnp.broadcast_to(partial, out_ref.shape)      # lane-dense store


def _vmem_capacity_bytes():
    """Physical VMEM per TensorCore; conservative (v7x) fallback if unknown."""
    try:
        cap = int(pltpu.get_tpu_info().vmem_capacity_bytes)
        if cap > 0:
            return cap
    except Exception:
        pass
    return 64 << 20


def _per_row_vmem_bytes(c, logit_itemsize):
    """VMEM bytes per logits row for one pipelined grid step."""
    c_pad = _round_up(c, _LANE)
    # 2 double-buffered logits tiles + 1 f32 working tile (upcast / exp input).
    logits_bytes = c_pad * (2 * logit_itemsize + 4)
    # (tile_n, 1) i32 target block pads to 128 lanes in VMEM, double-buffered.
    target_bytes = 2 * _LANE * 4
    return logits_bytes + target_bytes


def _pick_tile_n(n, c, logit_itemsize, budget_bytes, min_grid=4):
    """Largest multiple-of-8 row tile fitting the VMEM budget, keeping >= min_grid blocks."""
    padded_n = _round_up(max(n, 1), _SUBLANE)
    per_row = _per_row_vmem_bytes(c, logit_itemsize)
    rows = max(_SUBLANE, (budget_bytes // per_row) // _SUBLANE * _SUBLANE)
    # Keep >= min_grid blocks when N allows: shards the "parallel" axis across
    # v7x's two TensorCores and keeps the DMA pipeline overlapped.
    if padded_n >= _SUBLANE * min_grid:
        rows = min(rows, (padded_n // min_grid) // _SUBLANE * _SUBLANE)
    return int(min(rows, padded_n))


def focal_loss(logits, target, *, gamma=2, reduction="mean"):
    """Focal loss. logits: (N, C) float, target: (N,) int. reduction: mean|sum."""
    n, c = logits.shape
    itemsize = jnp.dtype(logits.dtype).itemsize

    cap = _vmem_capacity_bytes()
    vmem_limit = (cap * 3) // 4                 # 48 MiB on v7x, 96 MiB on v5e/v6e
    tile_n = _pick_tile_n(n, c, itemsize, vmem_limit // 3, min_grid=4)
    grid = pl.cdiv(n, tile_n)

    # For very large C even the minimal 8-row block can exceed the derived
    # budget; raise the scoped limit (up to capacity) so compilation succeeds.
    # TODO(synk): tile the class axis (online softmax) for vocab-scale C.
    needed = tile_n * _per_row_vmem_bytes(c, itemsize) + (1 << 20)
    vmem_limit = int(min(cap, max(vmem_limit, needed)))

    tgt2d = target.astype(jnp.int32).reshape(n, 1)

    kernel = functools.partial(_focal_loss_kernel, gamma=gamma,
                               n_total=n, tile_n=tile_n)

    partials = pl.pallas_call(
        kernel,
        out_shape=jax.ShapeDtypeStruct((grid, 8, 128), jnp.float32),
        grid_spec=pltpu.PrefetchScalarGridSpec(
            num_scalar_prefetch=0,
            grid=(grid,),
            in_specs=[
                pl.BlockSpec((tile_n, c), lambda i: (i, 0)),   # logits tile (ragged last block)
                pl.BlockSpec((tile_n, 1), lambda i: (i, 0)),   # target tile
            ],
            # Independent per-block partials -> no revisiting, grid is parallel.
            out_specs=pl.BlockSpec((1, 8, 128), lambda i: (i, 0, 0)),
        ),
        compiler_params=pltpu.CompilerParams(
            dimension_semantics=("parallel",),
            vmem_limit_bytes=vmem_limit,
        ),
    )(logits, tgt2d)

    total = jnp.sum(partials[:, 0, 0])
    if reduction == "mean":
        return total / jnp.float32(n)
    elif reduction == "sum":
        return total
    else:
        # TODO(synk): reduction='none' would require per-row loss outputs.
        raise NotImplementedError("reduction must be 'mean' or 'sum'")


def focal_loss_reference(logits, target, gamma=2):
    """Pure-JAX reference mirroring the PyTorch forward (alpha=None, mean)."""
    logpt = jax.nn.log_softmax(logits.astype(jnp.float32), axis=-1)
    pt = jnp.exp(logpt)
    logpt_t = jnp.take_along_axis(logpt, target[:, None], axis=1)
    pt_t = jnp.take_along_axis(pt, target[:, None], axis=1)
    loss = -((1.0 - pt_t) ** gamma) * logpt_t
    return loss.mean()


if __name__ == "__main__":
    key = jax.random.PRNGKey(0)
    k1, k2 = jax.random.split(key)

    # Small demo shape; deliberately not (8,128)-aligned to exercise the
    # ragged-last-block + in-kernel row-masking path (no wrapper padding).
    N, C = 50, 40
    logits = jax.random.normal(k1, (N, C), dtype=jnp.float32)
    target = jax.random.randint(k2, (N,), 0, C, dtype=jnp.int32)

    out = focal_loss(logits, target, gamma=2)
    out = jax.block_until_ready(out)

    ref = focal_loss_reference(logits, target, gamma=2)
    assert jnp.allclose(out, ref, rtol=1e-5, atol=1e-6), (out, ref)

    print("KERNEL_OK")
</pallas_src>

<mosaic_0001>
module attributes {stable_mosaic.version = 11 : i64} {
  func.func @_focal_loss_kernel(%arg0: i32, %arg1: memref<8x40xf32, #tpu.memory_space<vmem>>, %arg2: memref<8x1xi32, #tpu.memory_space<vmem>>, %arg3: memref<1x8x128xf32, #tpu.memory_space<vmem>>) attributes {dimension_semantics = [#tpu.dimension_semantics<parallel>], iteration_bounds = array<i64: 7>, scalar_prefetch = 0 : i64, scratch_operands = 0 : i64, tpu.core_type = #tpu.core_type<tc>, window_params = [{transform_indices = @transform_0, window_bounds = array<i64: 8, 40>}, {transform_indices = @transform_1, window_bounds = array<i64: 8, 1>}, {transform_indices = @transform_2, window_bounds = array<i64: 1, 8, 128>}]} {
    %c0 = arith.constant 0 : index
    %c0_0 = arith.constant 0 : index
    %0 = vector.load %arg1[%c0, %c0_0] : memref<8x40xf32, #tpu.memory_space<vmem>>, vector<8x40xf32>
    %cst = arith.constant dense<0xFF800000> : vector<8xf32>
    %1 = vector.multi_reduction <maximumf>, %0, %cst [1] : vector<8x40xf32> to vector<8xf32>
    %2 = vector.shape_cast %1 : vector<8xf32> to vector<8x1xf32>
    %3 = vector.broadcast %2 : vector<8x1xf32> to vector<8x40xf32>
    %4 = arith.subf %0, %3 : vector<8x40xf32>
    %5 = math.exp %4 : vector<8x40xf32>
    %cst_1 = arith.constant dense<0.000000e+00> : vector<8xf32>
    %6 = vector.multi_reduction <add>, %5, %cst_1 [1] : vector<8x40xf32> to vector<8xf32>
    %7 = vector.shape_cast %6 : vector<8xf32> to vector<8x1xf32>
    %c0_2 = arith.constant 0 : index
    %c0_3 = arith.constant 0 : index
    %8 = vector.load %arg2[%c0_2, %c0_3] : memref<8x1xi32, #tpu.memory_space<vmem>>, vector<8x1xi32>
    %9 = tpu.iota {dimensions = array<i32: 1>} : vector<8x40xi32>
    %10 = vector.broadcast %8 : vector<8x1xi32> to vector<8x40xi32>
    %11 = arith.cmpi eq, %9, %10 : vector<8x40xi32>
    %cst_4 = arith.constant 0.000000e+00 : f32
    %12 = vector.broadcast %cst_4 : f32 to vector<8x40xf32>
    %13 = arith.select %11, %0, %12 : vector<8x40xi1>, vector<8x40xf32>
    %cst_5 = arith.constant dense<0.000000e+00> : vector<8xf32>
    %14 = vector.multi_reduction <add>, %13, %cst_5 [1] : vector<8x40xf32> to vector<8xf32>
    %15 = vector.shape_cast %14 : vector<8xf32> to vector<8x1xf32>
    %16 = arith.subf %15, %2 : vector<8x1xf32>
    %17 = math.log %7 : vector<8x1xf32>
    %18 = arith.subf %16, %17 : vector<8x1xf32>
    %19 = math.exp %18 : vector<8x1xf32>
    %cst_6 = arith.constant 1.000000e+00 : f32
    %20 = vector.broadcast %cst_6 : f32 to vector<8x1xf32>
    %21 = arith.subf %20, %19 : vector<8x1xf32>
    %22 = arith.mulf %21, %21 : vector<8x1xf32>
    %cst_7 = arith.constant 0.000000e+00 : f32
    %23 = vector.broadcast %cst_7 : f32 to vector<8x1xf32>
    %24 = arith.subf %23, %22 : vector<8x1xf32>
    %25 = arith.mulf %24, %18 : vector<8x1xf32>
    %c8_i32 = arith.constant 8 : i32
    %26 = arith.muli %arg0, %c8_i32 : i32
    %27 = tpu.iota {dimensions = array<i32: 0>} : vector<8x1xi32>
    %28 = vector.broadcast %26 : i32 to vector<8x1xi32>
    %29 = arith.addi %28, %27 : vector<8x1xi32>
    %c50_i32 = arith.constant 50 : i32
    %30 = vector.broadcast %c50_i32 : i32 to vector<8x1xi32>
    %31 = arith.cmpi slt, %29, %30 : vector<8x1xi32>
    %cst_8 = arith.constant 0.000000e+00 : f32
    %32 = vector.broadcast %cst_8 : f32 to vector<8x1xf32>
    %33 = arith.select %31, %25, %32 : vector<8x1xi1>, vector<8x1xf32>
    %34 = vector.shape_cast %33 : vector<8x1xf32> to vector<1x8x1xf32>
    %cst_9 = arith.constant dense<0.000000e+00> : vector<1xf32>
    %35 = vector.multi_reduction <add>, %34, %cst_9 [1, 2] : vector<1x8x1xf32> to vector<1xf32>
    %36 = vector.shape_cast %35 : vector<1xf32> to vector<1x1x1xf32>
    %37 = vector.extract %36[0, 0, 0] : f32 from vector<1x1x1xf32>
    %38 = vector.broadcast %37 : f32 to vector<1x8x128xf32>
    %c0_10 = arith.constant 0 : index
    %c0_11 = arith.constant 0 : index
    %c0_12 = arith.constant 0 : index
    %39 = vector.load %arg3[%c0_10, %c0_11, %c0_12] : memref<1x8x128xf32, #tpu.memory_space<vmem>>, vector<1x8x128xf32>
    tpu.vector_store %arg3[%c0_10, %c0_11, %c0_12], %38 {strides = array<i32>} : memref<1x8x128xf32, #tpu.memory_space<vmem>>, vector<1x8x128xf32>,
    return
  }
  func.func @transform_0(%arg0: i32) -> (i32, i32) {
    %c0_i32 = arith.constant 0 : i32
    %c0_i32_0 = arith.constant 0 : i32
    return %arg0, %c0_i32 : i32, i32
  }
  func.func @transform_1(%arg0: i32) -> (i32, i32) {
    %c0_i32 = arith.constant 0 : i32
    %c0_i32_0 = arith.constant 0 : i32
    return %arg0, %c0_i32 : i32, i32
  }
  func.func @transform_2(%arg0: i32) -> (i32, i32, i32) {
    %c0_i32 = arith.constant 0 : i32
    %c0_i32_0 = arith.constant 0 : i32
    %c0_i32_1 = arith.constant 0 : i32
    return %arg0, %c0_i32, %c0_i32_0 : i32, i32, i32
  }
}

</mosaic_0001>

<bundles_post_ra>
// kernel: tpu_custom_call.1
= control target key start
LH: loop header
LB: loop body
LE: loop exit
PB: predicated region body
PF: predicated region fallthrough
CT: control target
= control target key end

     0   :  { %7 = vsyncpa [#allocation3], 0  ;;  %s542_s0 = inlined_call_operand.vmem [shape: f32[50,40], index: 0, kind: input, shape index: {}]   ;;  %s543_s1 = inlined_call_operand.vmem [shape: s32[50,1], index: 1, kind: input, shape index: {}]   ;;  %s544_s2 = inlined_call_operand.hbm [shape: f32[7,8,128], index: 2, kind: output, shape index: {}]  }
   0x1   :  { %9 = vsyncpa [#allocation3 + $0x1], 0  ;;  %s435_s9 = smov 0   ;;  %s437_s10 = smov 0  }
   0x2   :  { %s439_s11 = smov 0   ;;  %s441_s12 = smov 0  }
   0x3 LB: > { %s456_s13 = sadd.s32 4294967295, %s416_s12   ;;  %s293_s14 = sadd.s32 4294967294, %s416_s12   ;;  %s416_s12 = sphi %s441_s12, %s550_s12   ;;  %s412_s11 = sphi %s439_s11, %s549_s11   ;;  %s408_s10 = sphi %s437_s10, %s548_s10   ;;  %s404_s9 = sphi %s435_s9, %s547_s9  }
   0x4   : > { %s460_s15 = sadd.s32 1, %s416_s12   ;;  %s74_s16 = sadd.s32 1, %s412_s11 }
   0x5   : > { %s71_s17 = ssub.s32 %s416_s12, %s460_s15  ;;  %p84_p0 = scmp.ne.s32.totalorder %s412_s11, %s408_s10 }
   0x6   : > { %p72_p1 = scmp.eq.s32.totalorder %s71_s17, 0  ;;  %p85_p2 = scmp.eq.s32.totalorder %s456_s13, 6 }
   0x7   : > { %p90_p3 = scmp.ne.s32.totalorder %s408_s10, %s404_s9  ;;  %p91_p4 = scmp.eq.s32.totalorder %s293_s14, 6 }
   0x8   : > { %s471_s18 = scalar_select %p72_p1, %s412_s11, %s74_s16  }
   0x9   : > { %p473_p5 = por %p85_p2, %p84_p0  ;;  %p477_p6 = por %p91_p4, %p90_p3 }
   0xa   : > { %p296_p7 = scmp.ge.s32.totalorder %s416_s12, 1  ;;  %p123_p8 = scmp.lt.s32.totalorder %s416_s12, 8 }
   0xc   : > { %p124_p9 = pnand %p296_p7, %p123_p8 }
   0xd   : > { %p148_p10 = scmp.lt.s32.totalorder (!%p124_p9), %s456_s13, 6  ;;  %v418_v0 = vmov (!%p124_p9), 0   ;;  %vm157_vm0 = vcmask (!%p124_p9), 326656   ;;  %v168_v7 = vlaneseq (!%p124_p9)  ;;  %s300_s29 = sshll.u32 (!%p124_p9), %s456_s13, 3  ;;  %vm195_vm3 = vcmask (!%p124_p9), 7168  }
   0xe   : > { %127 = sbr.rel (%p124_p9) target bundleno = 584 (0x248), region = 28  ;;  %347 = vset.pattern.permute.xlu0 (!%p124_p9), %v418_v0  ;;  %v191_v22 = vstv (!%p124_p9), %s300_s29  ;;  %s145_s30 = sand.u32 (!%p124_p9), 1, %s408_s10  }
   0xf   : > { %v169_v8 = vand.u32 (!%p124_p9), 127, %v168_v7  ;;  %v190_v21 = vshrl.u32 (!%p124_p9), %v168_v7, 7  ;;  %s297_s3 = sshll.u32 (!%p124_p9), %s145_s30, 3  ;;  %s302_s6 = sshll.u32 (!%p124_p9), %s456_s13, 7 }
  0x10   : > { %s147_s4 = scalar_lea.vmem (!%p124_p9), [#allocation2], %s297_s3  ;;  %s502_s16 = scalar_lea.hbm (!%p124_p9), %s544_s2, %s302_s6 }
  0x11   : > { %v192_v25 = vadd.s32 (!%p124_p9), %v191_v22, %v190_v21  ;;  %s222_s5 = sshll.u32 (!%p124_p9), %s147_s4, 4  ;;  %s209_s17 = scalar_lea.sflag (!%p124_p9), [#allocation3], %s145_s30  ;;  %s497_s5 = int_to_ptr.vmem [resolvable:$true] %s222_s5 }
  0x13   : > { %vm193_vm2 = vcmp.lt.s32.totalorder (!%p124_p9), %v192_v25, 50 }
  0x15   : > { %s149_s21 = scalar_select %p148_p10, %s456_s13, 6 }
  0x16   : > { %s419_s13 = smov [#allocation2]  }
  0x17   : > { %s298_s22 = sshll.u32 %s149_s21, 3  ;;  %s354_s21 = scalar_lea.vmem %s497_s5, 128 }
  0x18   : > { %s151_s25 = scalar_lea.vmem %s542_s0, %s298_s22  ;;  %s155_s28 = scalar_lea.vmem %s543_s1, %s298_s22 }
  0x19   : > { %v156_v1 = vld [vmem:[%s151_s25] sm:$0xff]  ;;  %p355_p11 = scmp.ne.s32.totalorder %s497_s5, %s354_s21  ;;  %s358_s22 = sshll.u32 %s419_s13, 4  ;;  %s359_s22 = int_to_ptr.vmem [resolvable:$false] %s358_s22 }
  0x1a   : > { %v158_v2 = vsel %vm157_vm0, %v156_v1, -inf  ;;  %v167_v3 = vld [vmem:[%s155_s28] sm:$0xff]  ;;  %s360_s23 = scalar_lea.vmem %s359_s22, 256  ;;  %p361_p0 = scmp.lt.s32.totalorder %s497_s5, %s359_s22 }
  0x1b   : > { %159 = vmax.xlane.f32.xlu0 %v158_v2  ;;  %p356_p12 = pnand %p355_p11, %p473_p5  ;;  %p362_p1 = scmp.lt.s32.totalorder %s360_s23, %s354_s21 }
  0x1d   : > { %p357_p13 = pneg %p356_p12  ;;  %p363_p2 = por %p362_p1, %p361_p0 }
  0x1f   : > { %p364_p3 = pnand %p363_p2, %p357_p13 }
  0x31   : > { %171 = vperm.xlu0 %347, %v167_v3  }
  0xa8   : > { %v160_v4 = vpop.xlane.xlu0 %159 }
  0xa9   : > { %v161_v5 = vsub.f32 %v156_v1, %v160_v4 }
  0xab   : > { %v162_v6 = vmul.f32 1.442695, %v161_v5 }
  0xad   : > { %348 = vpow2.f32 %v162_v6 }
  0xb0   : > { %v172_v9 = vpop.permute.xlu0 %171 }
  0xb1   : > { %vm173_vm1 = vcmp.eq.s32.totalorder %v169_v8, %v172_v9 }
  0xb2   : > { %v174_v11 = vsel %vm173_vm1, %v156_v1, 0.0 }
  0xb3   : > { %v175_v13 = vsel %vm157_vm0, %v174_v11, 0.0 }
  0xb7   : > { %v349_v10 = vpop.eup %348 }
  0xb8   : > { %v164_v12 = vsel %vm157_vm0, %v349_v10, 0.0 }
  0xb9   : > { %165 = vadd.xlane.f32.xlu1 %v164_v12 }
  0xbd   : > { %176 = vadd.xlane.f32.xlu1 %v175_v13 }
 0x146   : > { %v166_v14 = vpop.xlane.xlu1 %165 }
 0x147   : > { %350 = vlog2.f32 %v166_v14 }
 0x14a   : > { %v177_v15 = vpop.xlane.xlu1 %176 }
 0x14b   : > { %v178_v18 = vsub.f32 %v177_v15, %v160_v4 }
 0x151   : > { %v351_v16 = vpop.eup %350 }
 0x152   : > { %v180_v17 = vmul.f32 0.6931472, %v351_v16 }
 0x154   : > { %v181_v19 = vsub.f32 %v178_v18, %v180_v17 }
 0x156   : > { %v182_v20 = vmul.f32 1.442695, %v181_v19 }
 0x158   : > { %352 = vpow2.f32 %v182_v20 }
 0x162   : > { %v353_v23 = vpop.eup %352 }
 0x163   : > { %v184_v24 = vsub.f32 1.0, %v353_v23 }
 0x165   : > { %v185_v26 = vmul.f32 %v184_v24, %v184_v24 }
 0x167   : > { %v186_v27 = vsub.f32 0.0, %v185_v26 }
 0x169   : > { %v187_v28 = vmul.f32 %v186_v27, %v181_v19 }
 0x16b   : > { %v194_v29 = vsel %vm193_vm2, %v187_v28, 0.0 }
 0x16c   : > { %v196_v30 = vsel %vm195_vm3, %v194_v29, 0.0 }
 0x16d   : > { %197 = vadd.xlane.f32.xlu1 %v196_v30 }
 0x1fa   : > { %v198_v31 = vpop.xlane.xlu1 %197 }
 0x1fb   : > { %v199_v32 = vrot.slane %v198_v31, 4 }
 0x1fd   : > { %v200_v33 = vadd.f32 %v199_v32, %v198_v31 }
 0x1ff   : > { %v201_v34 = vrot.slane %v200_v33, 2 }
 0x201   : > { %v202_v35 = vadd.f32 %v201_v34, %v200_v33 }
 0x203   : > { %v203_v36 = vrot.slane %v202_v35, 1 }
 0x205   : > { %v204_v37 = vadd.f32 %v203_v36, %v202_v35 }
 0x207   : > { %305 = vpush %v204_v37 }
 0x238   : > { %s306_s7 = spop %305 }
 0x239   : > { %v206_v38 = vstv %s306_s7 }
 0x23a   : > { %207 = vst [vmem:[%s147_s4] sm:$0xff] %v206_v38 }
 0x23b   : > { %367 = shalt.err (!%p364_p3)
}
 0x23c   : > { %s368_s24 = scalar_lea.hbm %s502_s16, 128  ;;  %s372_s27 = scalar_lea.hbm %s544_s2, 896 }
 0x23d   : > { %p369_p4 = scmp.ne.s32.totalorder %s502_s16, %s368_s24  ;;  %p373_p9 = scmp.lt.u32.totalorder %s502_s16, %s544_s2 }
 0x23e   : > { %p374_p10 = scmp.lt.u32.totalorder %s372_s27, %s368_s24  ;;  %p376_p12 = scmp.lt.u32.totalorder %s368_s24, %s502_s16 }
 0x23f   : > { %p370_p7 = pnand %p369_p4, %p473_p5 }
 0x240   : > { %p375_p11 = por %p374_p10, %p373_p9 }
 0x241   : > { %p371_p8 = pneg %p370_p7 }
 0x242   : > { %p377_p13 = por %p376_p12, %p375_p11 }
 0x244   : > { %p378_p0 = pnand %p377_p13, %p371_p8 }
 0x246   : > { %381 = shalt.err (!%p378_p0)
}
 0x247   : > { %307 = dma.vmem_to_hbm [thread:$0]  (%p473_p5), %s497_s5, 128, %s502_s16, %s209_s17  }
 0x248 PF: > { %p313_p1 = scmp.ge.s32.totalorder %s416_s12, 2  ;;  %s234_s30 = sand.u32 1, %s404_s9  }
 0x249   : > { %s235_s3 = scalar_lea.sflag [#allocation3], %s234_s30 }
 0x24a   : > { %p310_p2 = pnand %p313_p1, %p477_p6 }
 0x24c   : > { %399 = dma.done.wait (!%p310_p2), %s235_s3, 128  }
 0x24d   : > { %401 = vsyncadd (!%p310_p2), %s235_s3, 4294967168  ;;  %p12_p3 = scmp.ge.s32.totalorder %s460_s15, 9   ;;  %s547_s9 = smov %s408_s10 }
 0x24e   : > { %s548_s10 = smov %s412_s11  ;;  %s549_s11 = smov %s471_s18 }
 0x24f   : > { %s550_s12 = smov %s460_s15  ;;  %14 = sbr.rel (!%p12_p3) target bundleno = 3 (0x3), region = 66 }
 0x256   :  { %240 = vsyncpa [#allocation3], 1 }
 0x257   :  { %242 = vsyncpa [#allocation3 + $0x1], 1 }

</bundles_post_ra>
